<compile_context>
chip_gen: v6e
topology: v6e:2x2x1
jax: 0.10.0
libtpu: 0.0.40
codegen_flags: <defaults>
</compile_context>

<pallas_src>
import math
import functools
import numpy as np
import jax
import jax.numpy as jnp
from jax import lax
from jax.experimental import pallas as pl
from jax.experimental.pallas import tpu as pltpu


# Optional (accuracy-gated): run MXU operands in bf16 with f32 accumulation.
# Kept False so results match the f32 PyTorch reference within tight tolerance.
USE_BF16_MATMUL_OPERANDS = False


def _round_up(x, m):
    return ((x + m - 1) // m) * m


@functools.lru_cache(maxsize=1)
def _tpu_vmem_bytes():
    """Physical VMEM per TensorCore; conservative fallback if query fails."""
    try:
        cap = int(pltpu.get_tpu_info().vmem_capacity_bytes)
        if cap > 0:
            return cap
    except Exception:
        pass
    return 64 * 1024 * 1024  # v7x-safe default


def _maybe_cast(x):
    return x.astype(jnp.bfloat16) if USE_BF16_MATMUL_OPERANDS else x


# --------------------------- outputR = X @ W^T + b ---------------------------

def _matmul_bias_kernel(x_ref, w_ref, b_ref, o_ref, acc_ref):
    @pl.when(pl.program_id(2) == 0)
    def _():
        acc_ref[...] = jnp.zeros_like(acc_ref)

    # x tile: (tm, tk), w tile: (tn, tk) -> contract the shared K axis
    # (== x @ w.T) without ever materializing w.T in HBM.
    acc_ref[...] += lax.dot_general(
        _maybe_cast(x_ref[...]), _maybe_cast(w_ref[...]),
        dimension_numbers=(((1,), (1,)), ((), ())),
        preferred_element_type=jnp.float32)

    @pl.when(pl.program_id(2) == pl.num_programs(2) - 1)
    def _():
        o_ref[...] = (acc_ref[...] + b_ref[...]).astype(o_ref.dtype)


def _linear_pallas(x, w, b):
    """x: (M, K), w: (Cout, K), b: (Cout,) -> x @ w.T + b  (M, Cout)."""
    M, K = x.shape
    Cout = w.shape[0]

    vmem = _tpu_vmem_bytes()
    if vmem >= 96 * 1024 * 1024:           # v5e / v6e (128 MiB physical VMEM)
        tm_cap, tn_cap, tk_cap = 512, 512, 1024
        vlim = 64 * 1024 * 1024
    else:                                  # v7x (64 MiB per TC) or unknown
        tm_cap, tn_cap, tk_cap = 256, 256, 512
        vlim = 32 * 1024 * 1024

    tm = min(tm_cap, _round_up(M, 8))
    tn = min(tn_cap, _round_up(Cout, 128))
    tk = min(tk_cap, _round_up(K, 128))
    Mp, Kp, Np = _round_up(M, tm), _round_up(K, tk), _round_up(Cout, tn)

    # Only pad when needed — aligned shapes generate no extra HBM copies.
    xp = x if (Mp == M and Kp == K) else jnp.pad(x, ((0, Mp - M), (0, Kp - K)))
    wp = w if (Np == Cout and Kp == K) else jnp.pad(
        w, ((0, Np - Cout), (0, Kp - K)))
    b2 = b.reshape(1, -1).astype(jnp.float32)
    bp = b2 if Np == Cout else jnp.pad(b2, ((0, 0), (0, Np - Cout)))

    out = pl.pallas_call(
        _matmul_bias_kernel,
        out_shape=jax.ShapeDtypeStruct((Mp, Np), x.dtype),
        grid_spec=pltpu.PrefetchScalarGridSpec(
            num_scalar_prefetch=0,
            grid=(Mp // tm, Np // tn, Kp // tk),
            in_specs=[
                pl.BlockSpec((tm, tk), lambda i, j, k: (i, k)),
                pl.BlockSpec((tn, tk), lambda i, j, k: (j, k)),  # W as (Cout,K)
                pl.BlockSpec((1, tn), lambda i, j, k: (0, j)),
            ],
            out_specs=pl.BlockSpec((tm, tn), lambda i, j, k: (i, j)),
            scratch_shapes=[pltpu.VMEM((tm, tn), jnp.float32)],
        ),
        compiler_params=pltpu.CompilerParams(
            dimension_semantics=("parallel", "parallel", "arbitrary"),
            vmem_limit_bytes=vlim,
        ),
    )(xp, wp, bp)
    if Mp == M and Np == Cout:
        return out
    return out[:M, :Cout]


# ------------------------ outputSPD[n] = W @ S[n] @ W^T -----------------------

def _spd_kernel(s_ref, w_ref, o_ref):
    nb, ci, _ = s_ref.shape
    co = w_ref.shape[0]
    w = _maybe_cast(w_ref[...])                       # (Co, Ci), loaded once

    # (1) t[n, a, j] = sum_b S[n, a, b] * W[j, b]
    #     Fold the batch into the MXU M dimension: one (nb*Ci, Ci) x (Ci, Co)
    #     matmul instead of nb tiny batched matmuls (no broadcast of W).
    s_flat = _maybe_cast(s_ref[...]).reshape(nb * ci, ci)
    t = lax.dot_general(
        s_flat, w, dimension_numbers=(((1,), (1,)), ((), ())),
        preferred_element_type=jnp.float32).reshape(nb, ci, co)

    # (2) out2[n, j, i] = sum_a t[n, a, j] * W[i, a]
    #     Minor-dim transpose (XLU slot) puts the contraction axis last, then
    #     one more flattened MXU matmul over nb*Co rows.
    t_t = jnp.swapaxes(t, 1, 2)                       # (nb, Co, Ci)
    out2 = lax.dot_general(
        _maybe_cast(t_t.reshape(nb * co, ci)), w,
        dimension_numbers=(((1,), (1,)), ((), ())),
        preferred_element_type=jnp.float32).reshape(nb, co, co)

    # out[n, i, j] = out2[n, j, i] == (W @ S[n] @ W^T)[i, j].  Final minor-dim
    # transpose keeps exact semantics even when S is not symmetric.
    o_ref[...] = jnp.swapaxes(out2, 1, 2).astype(o_ref.dtype)


def _spd_pallas(spd, w):
    """spd: (N, Ci, Ci), w: (Co, Ci) -> (N, Co, Co), out[n] = W @ S[n] @ W^T."""
    N, Ci, _ = spd.shape
    Co = w.shape[0]

    # Pad channel dims to sublane multiples (8) so in-kernel flatten /
    # transpose reshapes are layout-clean.  Zero rows/cols of W only add zero
    # rows/cols to the result, which are sliced off below.
    Cip = _round_up(Ci, 8)
    Cop = _round_up(Co, 8)
    sp = spd if Cip == Ci else jnp.pad(
        spd, ((0, 0), (0, Cip - Ci), (0, Cip - Ci)))
    wp = w if (Cop == Co and Cip == Ci) else jnp.pad(
        w, ((0, Cop - Co), (0, Cip - Ci)))

    vmem = _tpu_vmem_bytes()
    if vmem >= 96 * 1024 * 1024:           # v5e / v6e
        budget, vlim = 44 * 1024 * 1024, 64 * 1024 * 1024
    else:                                  # v7x / unknown
        budget, vlim = 20 * 1024 * 1024, 32 * 1024 * 1024

    # Per-sample f32 VMEM: double-buffered S block + out block, plus the
    # in-kernel intermediates t / t^T / out2.
    per_sample = 4 * (2 * Cip * Cip + 3 * Cop * Cop + 2 * Cip * Cop)
    nb = int(max(1, min(128, budget // per_sample, N)))
    # Prefer >= 2 blocks on the parallel axis when N allows, so both v7x
    # TensorCores get work (negligible per-step overhead on single-TC chips).
    if nb == N and N >= 16:
        nb = (N + 1) // 2
    Npad = _round_up(N, nb)
    if Npad > N:
        sp = jnp.pad(sp, ((0, Npad - N), (0, 0), (0, 0)))
    # NOTE: for very large Ci (>= 512) a further win is an inner "arbitrary"
    # grid axis tiling the first contraction's reduction dim; not needed at
    # typical Linear_Geometry channel counts.

    out = pl.pallas_call(
        _spd_kernel,
        out_shape=jax.ShapeDtypeStruct((Npad, Cop, Cop), spd.dtype),
        grid_spec=pltpu.PrefetchScalarGridSpec(
            num_scalar_prefetch=0,
            grid=(Npad // nb,),
            in_specs=[
                pl.BlockSpec((nb, Cip, Cip), lambda n: (n, 0, 0)),
                pl.BlockSpec((Cop, Cip), lambda n: (0, 0)),
            ],
            out_specs=pl.BlockSpec((nb, Cop, Cop), lambda n: (n, 0, 0)),
        ),
        compiler_params=pltpu.CompilerParams(
            dimension_semantics=("parallel",),
            vmem_limit_bytes=vlim,
        ),
    )(sp, wp)
    if Npad == N and Cop == Co:
        return out
    return out[:N, :Co, :Co]


# --------------------------------- module ------------------------------------

@jax.jit
def _forward_r_only(weight, bias, inputR):
    return _linear_pallas(inputR, weight, bias)


@jax.jit
def _forward_full(weight, bias, inputR, inputSPD):
    outR = _linear_pallas(inputR, weight, bias)
    outSPD = _spd_pallas(inputSPD, weight)
    return outR, outSPD


class LinearGeometry:
    """JAX/Pallas port of Linear_Geometry (deterministic init)."""

    def __init__(self, in_features, out_features, key, bias=True):
        self.in_features = in_features
        self.out_features = out_features
        # kaiming_uniform_(a=sqrt(5)) on (out, in) == U(-1/sqrt(in), 1/sqrt(in))
        bound = 1.0 / math.sqrt(in_features)
        k_w, k_b = jax.random.split(key)
        self.weight = jax.random.uniform(
            k_w, (out_features, in_features), jnp.float32, -bound, bound)
        if bias:
            self.bias = jax.random.uniform(
                k_b, (out_features,), jnp.float32, -bound, bound)
        else:
            self.bias = jnp.zeros((out_features,), jnp.float32)

    def __call__(self, inputR, inputSPD):
        if inputSPD is None:
            return _forward_r_only(self.weight, self.bias, inputR), None
        return _forward_full(self.weight, self.bias, inputR, inputSPD)


if __name__ == "__main__":
    key = jax.random.PRNGKey(0)
    k_param, k_x, k_s = jax.random.split(key, 3)

    N, C_in, C_out = 4, 16, 8
    layer = LinearGeometry(C_in, C_out, k_param, bias=True)

    inputR = jax.random.normal(k_x, (N, C_in), jnp.float32)
    a = jax.random.normal(k_s, (N, C_in, C_in), jnp.float32)
    inputSPD = jnp.einsum("nab,ncb->nac", a, a) + 0.1 * jnp.eye(
        C_in, dtype=jnp.float32)

    outR, outSPD = layer(inputR, inputSPD)
    outR, outSPD = jax.block_until_ready((outR, outSPD))

    # Pure-JAX reference replicating the torch forward semantics.
    refR = inputR @ layer.weight.T + layer.bias
    # F.linear(F.linear(S,W).permute(0,2,1), W).permute(0,2,1) == W @ S @ W^T
    refSPD = jnp.einsum("ia,nab,jb->nij", layer.weight, inputSPD, layer.weight)

    np.testing.assert_allclose(np.asarray(outR), np.asarray(refR),
                               rtol=1e-5, atol=1e-5)
    np.testing.assert_allclose(np.asarray(outSPD), np.asarray(refSPD),
                               rtol=1e-4, atol=1e-4)
    print("KERNEL_OK")
</pallas_src>

<mosaic_0001>
module attributes {stable_mosaic.version = 11 : i64} {
  func.func @_matmul_bias_kernel(%arg0: i32, %arg1: i32, %arg2: i32, %arg3: memref<8x128xf32, #tpu.memory_space<vmem>>, %arg4: memref<128x128xf32, #tpu.memory_space<vmem>>, %arg5: memref<1x128xf32, #tpu.memory_space<vmem>>, %arg6: memref<8x128xf32, #tpu.memory_space<vmem>>, %arg7: memref<8x128xf32, #tpu.memory_space<vmem>>) attributes {dimension_semantics = [#tpu.dimension_semantics<parallel>, #tpu.dimension_semantics<parallel>, #tpu.dimension_semantics<arbitrary>], iteration_bounds = array<i64: 1, 1, 1>, scalar_prefetch = 0 : i64, scratch_operands = 1 : i64, tpu.core_type = #tpu.core_type<tc>, window_params = [{transform_indices = @transform_0, window_bounds = array<i64: 8, 128>}, {transform_indices = @transform_1, window_bounds = array<i64: 128, 128>}, {transform_indices = @transform_2, window_bounds = array<i64: 1, 128>}, {transform_indices = @transform_3, window_bounds = array<i64: 8, 128>}]} {
    %c0_i32 = arith.constant 0 : i32
    %0 = arith.cmpi eq, %arg2, %c0_i32 : i32
    %1 = arith.extui %0 : i1 to i32
    %c0_i32_0 = arith.constant 0 : i32
    %2 = arith.cmpi ne, %1, %c0_i32_0 : i32
    scf.if %2 {
      %cst_10 = arith.constant 0.000000e+00 : f32
      %12 = vector.broadcast %cst_10 : f32 to vector<8x128xf32>
      %c0_11 = arith.constant 0 : index
      %c0_12 = arith.constant 0 : index
      %13 = vector.load %arg7[%c0_11, %c0_12] : memref<8x128xf32, #tpu.memory_space<vmem>>, vector<8x128xf32>
      tpu.vector_store %arg7[%c0_11, %c0_12], %12 {strides = array<i32>} : memref<8x128xf32, #tpu.memory_space<vmem>>, vector<8x128xf32>,
    } else {
    }
    %c0 = arith.constant 0 : index
    %c0_1 = arith.constant 0 : index
    %3 = vector.load %arg7[%c0, %c0_1] : memref<8x128xf32, #tpu.memory_space<vmem>>, vector<8x128xf32>
    %c0_2 = arith.constant 0 : index
    %c0_3 = arith.constant 0 : index
    %4 = vector.load %arg3[%c0_2, %c0_3] : memref<8x128xf32, #tpu.memory_space<vmem>>, vector<8x128xf32>
    %c0_4 = arith.constant 0 : index
    %c0_5 = arith.constant 0 : index
    %5 = vector.load %arg4[%c0_4, %c0_5] : memref<128x128xf32, #tpu.memory_space<vmem>>, vector<128x128xf32>
    %cst = arith.constant dense<0.000000e+00> : vector<8x128xf32>
    %6 = tpu.matmul %4, %5, %cst {dimension_numbers = #tpu.dot_dimension_numbers<[1], [1], [0], [0], [0, 0, 1, 0], [], []>} : vector<8x128xf32>, vector<128x128xf32>, vector<8x128xf32> -> vector<8x128xf32>
    %7 = arith.addf %3, %6 : vector<8x128xf32>
    %c0_6 = arith.constant 0 : index
    %c0_7 = arith.constant 0 : index
    %8 = vector.load %arg7[%c0_6, %c0_7] : memref<8x128xf32, #tpu.memory_space<vmem>>, vector<8x128xf32>
    tpu.vector_store %arg7[%c0_6, %c0_7], %7 {strides = array<i32>} : memref<8x128xf32, #tpu.memory_space<vmem>>, vector<8x128xf32>,
    %c0_i32_8 = arith.constant 0 : i32
    %9 = arith.cmpi eq, %arg2, %c0_i32_8 : i32
    %10 = arith.extui %9 : i1 to i32
    %c0_i32_9 = arith.constant 0 : i32
    %11 = arith.cmpi ne, %10, %c0_i32_9 : i32
    scf.if %11 {
      %c0_10 = arith.constant 0 : index
      %c0_11 = arith.constant 0 : index
      %12 = vector.load %arg7[%c0_10, %c0_11] : memref<8x128xf32, #tpu.memory_space<vmem>>, vector<8x128xf32>
      %c0_12 = arith.constant 0 : index
      %c0_13 = arith.constant 0 : index
      %13 = vector.load %arg5[%c0_12, %c0_13] : memref<1x128xf32, #tpu.memory_space<vmem>>, vector<1x128xf32>
      %14 = vector.broadcast %13 : vector<1x128xf32> to vector<8x128xf32>
      %15 = arith.addf %12, %14 : vector<8x128xf32>
      %c0_14 = arith.constant 0 : index
      %c0_15 = arith.constant 0 : index
      %16 = vector.load %arg6[%c0_14, %c0_15] : memref<8x128xf32, #tpu.memory_space<vmem>>, vector<8x128xf32>
      tpu.vector_store %arg6[%c0_14, %c0_15], %15 {strides = array<i32>} : memref<8x128xf32, #tpu.memory_space<vmem>>, vector<8x128xf32>,
    } else {
    }
    return
  }
  func.func @transform_0(%arg0: i32, %arg1: i32, %arg2: i32) -> (i32, i32) {
    %c0_i32 = arith.constant 0 : i32
    return %arg0, %arg2 : i32, i32
  }
  func.func @transform_1(%arg0: i32, %arg1: i32, %arg2: i32) -> (i32, i32) {
    %c0_i32 = arith.constant 0 : i32
    return %arg1, %arg2 : i32, i32
  }
  func.func @transform_2(%arg0: i32, %arg1: i32, %arg2: i32) -> (i32, i32) {
    %c0_i32 = arith.constant 0 : i32
    %c0_i32_0 = arith.constant 0 : i32
    return %c0_i32, %arg1 : i32, i32
  }
  func.func @transform_3(%arg0: i32, %arg1: i32, %arg2: i32) -> (i32, i32) {
    %c0_i32 = arith.constant 0 : i32
    return %arg0, %arg1 : i32, i32
  }
}

module attributes {stable_mosaic.version = 11 : i64} {
  func.func @_spd_kernel(%arg0: i32, %arg1: memref<4x16x16xf32, #tpu.memory_space<vmem>>, %arg2: memref<8x16xf32, #tpu.memory_space<vmem>>, %arg3: memref<4x8x8xf32, #tpu.memory_space<vmem>>) attributes {dimension_semantics = [#tpu.dimension_semantics<parallel>], iteration_bounds = array<i64: 1>, scalar_prefetch = 0 : i64, scratch_operands = 0 : i64, tpu.core_type = #tpu.core_type<tc>, window_params = [{transform_indices = @transform_0, window_bounds = array<i64: 4, 16, 16>}, {pipeline_mode = #tpu.pipeline_mode<synchronous>, transform_indices = @transform_1, window_bounds = array<i64: 8, 16>}, {transform_indices = @transform_2, window_bounds = array<i64: 4, 8, 8>}]} {
    %c0 = arith.constant 0 : index
    %c0_0 = arith.constant 0 : index
    %0 = vector.load %arg2[%c0, %c0_0] : memref<8x16xf32, #tpu.memory_space<vmem>>, vector<8x16xf32>
    %c0_1 = arith.constant 0 : index
    %c0_2 = arith.constant 0 : index
    %c0_3 = arith.constant 0 : index
    %1 = vector.load %arg1[%c0_1, %c0_2, %c0_3] : memref<4x16x16xf32, #tpu.memory_space<vmem>>, vector<4x16x16xf32>
    %2 = vector.shape_cast %1 : vector<4x16x16xf32> to vector<64x16xf32>
    %cst = arith.constant dense<0.000000e+00> : vector<64x8xf32>
    %3 = tpu.matmul %2, %0, %cst {dimension_numbers = #tpu.dot_dimension_numbers<[1], [1], [0], [0], [0, 0, 1, 0], [], []>} : vector<64x16xf32>, vector<8x16xf32>, vector<64x8xf32> -> vector<64x8xf32>
    %4 = vector.shape_cast %3 : vector<64x8xf32> to vector<4x16x8xf32>
    %5 = tpu.transpose %4, [0, 2, 1] : vector<4x16x8xf32> -> vector<4x8x16xf32>
    %6 = vector.shape_cast %5 : vector<4x8x16xf32> to vector<32x16xf32>
    %cst_4 = arith.constant dense<0.000000e+00> : vector<32x8xf32>
    %7 = tpu.matmul %6, %0, %cst_4 {dimension_numbers = #tpu.dot_dimension_numbers<[1], [1], [0], [0], [0, 0, 1, 0], [], []>} : vector<32x16xf32>, vector<8x16xf32>, vector<32x8xf32> -> vector<32x8xf32>
    %8 = vector.shape_cast %7 : vector<32x8xf32> to vector<4x8x8xf32>
    %9 = tpu.transpose %8, [0, 2, 1] : vector<4x8x8xf32> -> vector<4x8x8xf32>
    %c0_5 = arith.constant 0 : index
    %c0_6 = arith.constant 0 : index
    %c0_7 = arith.constant 0 : index
    %10 = vector.load %arg3[%c0_5, %c0_6, %c0_7] : memref<4x8x8xf32, #tpu.memory_space<vmem>>, vector<4x8x8xf32>
    tpu.vector_store %arg3[%c0_5, %c0_6, %c0_7], %9 {strides = array<i32>} : memref<4x8x8xf32, #tpu.memory_space<vmem>>, vector<4x8x8xf32>,
    return
  }
  func.func @transform_0(%arg0: i32) -> (i32, i32, i32) {
    %c0_i32 = arith.constant 0 : i32
    %c0_i32_0 = arith.constant 0 : i32
    %c0_i32_1 = arith.constant 0 : i32
    return %arg0, %c0_i32, %c0_i32_0 : i32, i32, i32
  }
  func.func @transform_1(%arg0: i32) -> (i32, i32) {
    %c0_i32 = arith.constant 0 : i32
    %c0_i32_0 = arith.constant 0 : i32
    %c0_i32_1 = arith.constant 0 : i32
    return %c0_i32, %c0_i32_0 : i32, i32
  }
  func.func @transform_2(%arg0: i32) -> (i32, i32, i32) {
    %c0_i32 = arith.constant 0 : i32
    %c0_i32_0 = arith.constant 0 : i32
    %c0_i32_1 = arith.constant 0 : i32
    return %arg0, %c0_i32, %c0_i32_0 : i32, i32, i32
  }
}

</mosaic_0001>

<bundles_post_ra>
// kernel: _forward_full.2
= control target key start
LH: loop header
LB: loop body
LE: loop exit
PB: predicated region body
PF: predicated region fallthrough
CT: control target
= control target key end

     0   :  { %v181_v0 = vmov 0.0   ;;  %vm182_vm0 = vmmov 0   ;;  %s260_s1 = inlined_call_operand.vmem [shape: f32[128,128], index: 1, kind: input, shape index: {}]   ;;  %s261_s0 = inlined_call_operand.vmem [shape: f32[8,128], index: 0, kind: input, shape index: {}]   ;;  %s262_s2 = inlined_call_operand.vmem [shape: f32[1,128], index: 2, kind: input, shape index: {}]   ;;  %s263_s3 = inlined_call_operand.vmem [shape: f32[8,128], index: 3, kind: output, shape index: {}]  }
   0x1   :  { %144 = vmatprep.subr.mxu0 %v181_v0  ;;  %v36_v1 = vld [vmem:[%s260_s1 + $0x78] sm:$0xff]  ;;  %176 = vmatprep.mubr.msk.f32.mxu0 %vm182_vm0, %v181_v0  ;;  %v35_v2 = vld [vmem:[%s260_s1 + $0x70] sm:$0xff]  ;;  %v34_v3 = vld [vmem:[%s260_s1 + $0x68] sm:$0xff] }
   0x2   :  { %145 = vmatpush3.xpose.msra.mxu0 %v36_v1  ;;  %v33_v4 = vld [vmem:[%s260_s1 + $0x60] sm:$0xff]  ;;  %v32_v5 = vld [vmem:[%s260_s1 + $0x58] sm:$0xff]  ;;  %v31_v6 = vld [vmem:[%s260_s1 + $0x50] sm:$0xff] }
   0x3   :  { %146 = vmatprep.subr.mxu0 %v181_v0  ;;  %v30_v7 = vld [vmem:[%s260_s1 + $0x48] sm:$0xff]  ;;  %v29_v8 = vld [vmem:[%s260_s1 + $0x40] sm:$0xff]  ;;  %v28_v9 = vld [vmem:[%s260_s1 + $0x38] sm:$0xff] }
   0x4   :  { %v27_v10 = vld [vmem:[%s260_s1 + $0x30] sm:$0xff]  ;;  %v26_v11 = vld [vmem:[%s260_s1 + $0x28] sm:$0xff]  ;;  %v25_v12 = vld [vmem:[%s260_s1 + $0x20] sm:$0xff] }
   0x5   :  { %v24_v13 = vld [vmem:[%s260_s1 + $0x18] sm:$0xff]  ;;  %v23_v14 = vld [vmem:[%s260_s1 + $0x10] sm:$0xff]  ;;  %v22_v15 = vld [vmem:[%s260_s1 + $0x8] sm:$0xff] }
   0x6   :  { %147 = vmatpush3.xpose.msra.mxu0 %v35_v2  ;;  %v21_v16 = vld [vmem:[%s260_s1] sm:$0xff] }
   0x7   :  { %148 = vmatprep.subr.mxu0 %v181_v0  ;;  %v20_v17 = vld [vmem:[%s261_s0] sm:$0xff] }
   0x8   :  { %v126_v18 = vld [vmem:[%s262_s2] ss:$0 sm:$0xff] }
   0xa   :  { %149 = vmatpush3.xpose.msra.mxu0 %v34_v3 }
   0xb   :  { %150 = vmatprep.subr.mxu0 %v181_v0 }
   0xe   :  { %151 = vmatpush3.xpose.msra.mxu0 %v33_v4 }
   0xf   :  { %152 = vmatprep.subr.mxu0 %v181_v0 }
  0x12   :  { %153 = vmatpush3.xpose.msra.mxu0 %v32_v5 }
  0x13   :  { %154 = vmatprep.subr.mxu0 %v181_v0 }
  0x16   :  { %155 = vmatpush3.xpose.msra.mxu0 %v31_v6 }
  0x17   :  { %156 = vmatprep.subr.mxu0 %v181_v0 }
  0x1a   :  { %157 = vmatpush3.xpose.msra.mxu0 %v30_v7 }
  0x1b   :  { %158 = vmatprep.subr.mxu0 %v181_v0 }
  0x1e   :  { %159 = vmatpush3.xpose.msra.mxu0 %v29_v8 }
  0x1f   :  { %160 = vmatprep.subr.mxu0 %v181_v0 }
  0x22   :  { %161 = vmatpush3.xpose.msra.mxu0 %v28_v9 }
  0x23   :  { %162 = vmatprep.subr.mxu0 %v181_v0 }
  0x26   :  { %163 = vmatpush3.xpose.msra.mxu0 %v27_v10 }
  0x27   :  { %164 = vmatprep.subr.mxu0 %v181_v0 }
  0x2a   :  { %165 = vmatpush3.xpose.msra.mxu0 %v26_v11 }
  0x2b   :  { %166 = vmatprep.subr.mxu0 %v181_v0 }
  0x2e   :  { %167 = vmatpush3.xpose.msra.mxu0 %v25_v12 }
  0x2f   :  { %168 = vmatprep.subr.mxu0 %v181_v0 }
  0x32   :  { %169 = vmatpush3.xpose.msra.mxu0 %v24_v13 }
  0x33   :  { %170 = vmatprep.subr.mxu0 %v181_v0 }
  0x36   :  { %171 = vmatpush3.xpose.msra.mxu0 %v23_v14 }
  0x37   :  { %172 = vmatprep.subr.mxu0 %v181_v0 }
  0x3a   :  { %173 = vmatpush3.xpose.msra.mxu0 %v22_v15 }
  0x3b   :  { %174 = vmatprep.subr.mxu0 %v181_v0 }
  0x3e   :  { %175 = vmatpush3.xpose.msra.mxu0 %v21_v16 }
  0x41   :  { %177 = vmatmul.mubr.f32.vlgmr.msra.gmra.mxu0 %v20_v17 }
 0x101   :  { %v103_v19 = vpop.f32.mrf.mxu0 }
 0x102   :  { %v120_v20 = vadd.f32 %v126_v18, %v103_v19 }
 0x103   :  { %v178_v21 = vpop.f32.mrf.mxu0 }
 0x104   :  { %121 = vst [vmem:[%s263_s3] sm:$0xff] %v120_v20 }

// kernel: _forward_full.3
= control target key start
LH: loop header
LB: loop body
LE: loop exit
PB: predicated region body
PF: predicated region fallthrough
CT: control target
= control target key end

     0   :  { %vm21_vm0 = vcmask 130048   ;;  %s672_s0 = inlined_call_operand.vmem [shape: f32[4,16,16], index: 0, kind: input, shape index: {}]   ;;  %s673_s1 = inlined_call_operand.vmem [shape: f32[8,16], index: 1, kind: input, shape index: {}]   ;;  %s674_s2 = inlined_call_operand.hbm [shape: f32[4,8,8], index: 2, kind: output, shape index: {}]  }
   0x1   :  { %v12_v0 = vld [vmem:[%s673_s1] sm:$0xff]  ;;  %v14_v2 = vld [vmem:[%s672_s0 + $0x8] sm:$0xff]  ;;  %v19_v3 = vld [vmem:[%s672_s0 + $0x30] sm:$0xff] }
   0x2   :  { %v13_v1 = vld [vmem:[%s672_s0] sm:$0xff]  ;;  %556 = vmatprep.subr.msk.mxu0 %vm21_vm0, %v12_v0  ;;  %578 = vmatprep.subr.msk.mxu1 %vm21_vm0, %v12_v0  ;;  %v15_v4 = vld [vmem:[%s672_s0 + $0x10] sm:$0xff]  ;;  %v20_v5 = vld [vmem:[%s672_s0 + $0x38] sm:$0xff] }
   0x3   :  { %558 = vmatprep.mubr.msk.f32.mxu0 %vm21_vm0, %v13_v1  ;;  %557 = vmatpush3.xpose.msk.msra.mxu0 %vm21_vm0, %v12_v0 }
   0x4   :  { %579 = vmatpush3.xpose.msk.msra.mxu1 %vm21_vm0, %v12_v0  ;;  %567 = vmatprep.mubr.msk.f32.mxu1 %vm21_vm0, %v19_v3 }
   0x5   :  { %7 = vsyncpa [#allocation3], 0  ;;  %570 = vmatprep.subr.msk.mxu1 %vm21_vm0, %v12_v0  ;;  %v16_v6 = vld [vmem:[%s672_s0 + $0x18] sm:$0xff]  ;;  %v17_v7 = vld [vmem:[%s672_s0 + $0x20] sm:$0xff]  ;;  %vm507_vm1 = vcmask 64512  }
   0x6   :  { %559 = vmatmul.mubr.msk.f32.vlgmr.msra.gmra.mxu0 %vm21_vm0, %v14_v2  ;;  %v18_v8 = vld [vmem:[%s672_s0 + $0x28] sm:$0xff]  ;;  %s606_s0 = smov [#allocation2]  }
   0x7   :  { %561 = vmatprep.mubr.msk.f32.mxu0 %vm21_vm0, %v15_v4  ;;  %568 = vmatmul.mubr.msk.f32.vlgmr.msra.gmra.mxu1 %vm21_vm0, %v20_v5  ;;  %s517_s26 = sshll.u32 %s606_s0, 4  ;;  %s518_s26 = int_to_ptr.vmem [resolvable:$true] %s517_s26 }
   0x8   :  { %571 = vmatpush3.xpose.msk.msra.mxu1 %vm21_vm0, %v12_v0  ;;  %s584_s27 = scalar_lea.vmem %s518_s26, 512  ;;  %p589_p1 = scmp.lt.s32.totalorder %s518_s26, %s518_s26 }
   0x9   :  { %p585_p0 = scmp.ne.s32.totalorder %s518_s26, %s584_s27  ;;  %p590_p2 = scmp.lt.s32.totalorder %s584_s27, %s584_s27 }
   0xa   :  { %562 = vmatmul.mubr.msk.f32.gmra.mxu0 %vm21_vm0, %v16_v6 }
   0xb   :  { %564 = vmatprep.mubr.msk.f32.mxu0 %vm21_vm0, %v17_v7  ;;  %p591_p3 = por %p590_p2, %p589_p1 }
   0xd   :  { %p592_p4 = pnand %p591_p3, %p585_p0 }
   0xe   :  { %565 = vmatmul.mubr.msk.f32.gmra.mxu0 %vm21_vm0, %v18_v8 }
  0xc6   :  { %v560_v9 = vpop.f32.mrf.mxu0 }
  0xc7   :  { %v569_v15 = vpop.f32.mrf.mxu1 }
  0xc8   :  { %v115_v10 = vpop.f32.mrf.mxu0 }
  0xc9   :  { %154 = vxpose.xlu0.b32.start [1/2] (short) (narrow) %v115_v10, 8  ;;  %v145_v16 = vpop.f32.mrf.mxu1 }
  0xca   :  { %v563_v11 = vpop.f32.mrf.mxu0 }
  0xcc   :  { %v125_v12 = vpop.f32.mrf.mxu0 }
  0xcd   :  { %155 = vxpose.xlu0.b32.end [2/2] (short) (narrow) %v560_v9, 8  ;;  %186 = vxpose.xlu1.b32.start [1/2] (short) (narrow) %v125_v12, 8 }
  0xce   :  { %v566_v13 = vpop.f32.mrf.mxu0 }
  0xd0   :  { %v135_v14 = vpop.f32.mrf.mxu0 }
  0xd1   :  { %187 = vxpose.xlu1.b32.end [2/2] (short) (narrow) %v563_v11, 8  ;;  %218 = vxpose.xlu0.b32.start [1/2] (short) (narrow) %v135_v14, 8 }
  0xd5   :  { %250 = vxpose.xlu1.b32.start [1/2] (short) (narrow) %v145_v16, 8  ;;  %219 = vxpose.xlu0.b32.end [2/2] (short) (narrow) %v566_v13, 8 }
  0xd9   :  { %251 = vxpose.xlu1.b32.end [2/2] (short) (narrow) %v569_v15, 8 }
 0x145   :  { %v170_v17 = vpop.trf.xlu0 }
 0x146   :  { %572 = vmatprep.mubr.msk.f32.mxu1 %vm21_vm0, %v170_v17 }
 0x149   :  { %v202_v18 = vpop.trf.xlu1 }
 0x14a   :  { %573 = vmatmul.mubr.msk.f32.vlgmr.msra.gmra.mxu1 %vm21_vm0, %v202_v18 }
 0x14d   :  { %v234_v19 = vpop.trf.xlu0 }
 0x14e   :  { %575 = vmatprep.mubr.msk.f32.mxu1 %vm21_vm0, %v234_v19 }
 0x151   :  { %v266_v20 = vpop.trf.xlu1 }
 0x152   :  { %576 = vmatmul.mubr.msk.f32.gmra.mxu1 %vm21_vm0, %v266_v20 }
 0x20a   :  { %v574_v21 = vpop.f32.mrf.mxu1 }
 0x20b   :  { %411 = vxpose.xlu1.b32.start.end [1/1] (short) (narrow) %v574_v21, 8 }
 0x20c   :  { %v360_v22 = vpop.f32.mrf.mxu1 }
 0x20d   :  { %379 = vxpose.xlu0.b32.start.end [1/1] (short) (narrow) %v360_v22, 8 }
 0x212   :  { %v577_v23 = vpop.f32.mrf.mxu1 }
 0x213   :  { %475 = vxpose.xlu1.b32.start.end [1/1] (short) (narrow) %v577_v23, 8 }
 0x214   :  { %v370_v24 = vpop.f32.mrf.mxu1 }
 0x215   :  { %443 = vxpose.xlu0.b32.start.end [1/1] (short) (narrow) %v370_v24, 8 }
 0x287   :  { %v427_v25 = vpop.trf.xlu1 }
 0x288   :  { %509 = vst.msk [vmem:[#allocation2 + $0x8] sm:$0xff] %vm507_vm1, %v427_v25 }
 0x289   :  { %v395_v26 = vpop.trf.xlu0 }
 0x28a   :  { %508 = vst.msk [vmem:[#allocation2] sm:$0xff] %vm507_vm1, %v395_v26 }
 0x28f   :  { %v491_v27 = vpop.trf.xlu1 }
 0x290   :  { %511 = vst.msk [vmem:[#allocation2 + $0x18] sm:$0xff] %vm507_vm1, %v491_v27 }
 0x291   :  { %v459_v28 = vpop.trf.xlu0 }
 0x292   :  { %510 = vst.msk [vmem:[#allocation2 + $0x10] sm:$0xff] %vm507_vm1, %v459_v28 }
 0x293   :  { %595 = shalt.err (!%p592_p4)
}
 0x294   :  { %s607_s28 = smov 128   ;;  %s608_s29 = smov 8  }
 0x295   :  { %523 = dma.vmem_to_hbm [thread:$0]  %s518_s26, 512, %s674_s2, [#allocation3], %s607_s28, %s607_s28, %s608_s29  }
 0x296   :  { %604 = dma.done.wait [#allocation3], 512  }
 0x297   :  { %605 = vsyncadd [#allocation3], 4294966784 }
 0x298   :  { %527 = vsyncpa [#allocation3], 1 }

</bundles_post_ra>
